<compile_context>
chip_gen: v7x
topology: tpu7x:2x2x1
jax: 0.10.0
libtpu: 0.0.40
codegen_flags: <defaults>
</compile_context>

<pallas_src>
import functools

import jax
import jax.numpy as jnp
from jax import lax
from jax.experimental import pallas as pl
from jax.experimental.pallas import tpu as pltpu


def _round_up(x, m):
    return ((x + m - 1) // m) * m


def _vmem_policy():
    """Generation-aware scoped-VMEM limit and tile-planning budget (bytes)."""
    try:
        cap = int(pltpu.get_tpu_info().vmem_capacity_bytes)
    except Exception:                    # no query available: assume smallest (v7x)
        cap = 64 * 1024 * 1024
    if cap >= 100 * 1024 * 1024:         # v5e / v6e: 128 MiB physical VMEM
        vmem_limit = 96 * 1024 * 1024
    else:                                # v7x: 64 MiB physical, leave headroom
        vmem_limit = 42 * 1024 * 1024
    budget = int(vmem_limit * 0.70)      # plan all buffers within ~70% of the limit
    return vmem_limit, budget


def _pick_tile(n_pad, candidates, prefer_two_blocks=False):
    """Largest candidate dividing n_pad; optionally keep >=2 blocks (v7x megacore)."""
    tile = 128
    for c in candidates:
        if c <= n_pad and n_pad % c == 0:
            tile = c
            break
    if prefer_two_blocks and n_pad // tile < 2 and n_pad >= 256:
        tile = n_pad // 2                # still a multiple of 128 and divides n_pad
    return tile


# ---------------------------------------------------------------------------
# Pass 1:  d[i] = rowsum(adj)[i]^-1/2   (non-positive rowsum -> 0)
# Lane-parallel (tm,128) partial sums accumulate in VMEM scratch across column
# tiles (pure VALU adds that hide under the DMA stream); the single cross-lane
# reduce + rsqrt happen only at the last column step of each row block.
# ---------------------------------------------------------------------------
def _dinv_kernel(adj_ref, d_ref, acc_ref):
    c = pl.program_id(1)

    @pl.when(c == 0)
    def _():
        acc_ref[...] = jnp.zeros_like(acc_ref)

    a = adj_ref[...]                                   # (tm, tc) f32 straight from HBM
    tc = a.shape[1]
    part = a[:, 0:128]
    for g in range(1, tc // 128):                      # static 128-lane-group adds
        part = part + a[:, g * 128:(g + 1) * 128]
    acc_ref[...] += part

    @pl.when(c == pl.num_programs(1) - 1)
    def _():
        rs = jnp.sum(acc_ref[...], axis=1, keepdims=True)   # one XLU reduce / row block
        d_ref[...] = jnp.where(rs > 0.0, lax.rsqrt(rs), 0.0)


def _plan_pass1(n_pad, budget):
    tc = _pick_tile(n_pad, (2048, 1024, 512, 256, 128))
    tm = _pick_tile(n_pad, (1024, 512, 256, 128), prefer_two_blocks=True)
    while 2 * tm * tc * 4 + 3 * tm * 128 * 4 > budget:
        if tc > 128:
            tc //= 2
        elif tm > 128:
            tm //= 2
        else:
            break
    return tm, tc


def _compute_d_inv_sqrt(adj, *, tm, tc, vmem_limit):
    n_pad = adj.shape[0]
    return pl.pallas_call(
        _dinv_kernel,
        out_shape=jax.ShapeDtypeStruct((n_pad, 1), jnp.float32),
        grid=(n_pad // tm, n_pad // tc),
        in_specs=[pl.BlockSpec((tm, tc), lambda i, c: (i, c))],
        out_specs=pl.BlockSpec((tm, 1), lambda i, c: (i, 0)),
        scratch_shapes=[pltpu.VMEM((tm, 128), jnp.float32)],
        compiler_params=pltpu.CompilerParams(
            dimension_semantics=("parallel", "arbitrary"),
            vmem_limit_bytes=vmem_limit),
    )(adj)


# ---------------------------------------------------------------------------
# Pass 2:  out = diag(d_row) @ adj @ feat_scaled
# feat_scaled already carries the column-side d[j] scale.  The output block is
# resident across the k (reduction) axis and used directly as the f32
# accumulator; the adjacency tile is cast to the MXU dtype in-kernel.
# ---------------------------------------------------------------------------
def _gcn_kernel_streamed(compute_dtype, d_ref, adj_ref, feat_ref, out_ref):
    k = pl.program_id(1)

    @pl.when(k == 0)
    def _():
        out_ref[...] = jnp.zeros_like(out_ref)

    a = adj_ref[...].astype(compute_dtype)             # VPU cast feeding the MXU
    out_ref[...] += jnp.dot(a, feat_ref[...], preferred_element_type=jnp.float32)

    @pl.when(k == pl.num_programs(1) - 1)
    def _():
        out_ref[...] = d_ref[...] * out_ref[...]        # row-side d scale


def _gcn_kernel_resident(tk, compute_dtype, d_ref, adj_ref, feat_ref, out_ref):
    # feat_ref holds the full (n_pad, h_pad) d-scaled feature slab in VMEM
    # (constant index_map -> DMA'd once, never re-streamed across the grid).
    k = pl.program_id(1)

    @pl.when(k == 0)
    def _():
        out_ref[...] = jnp.zeros_like(out_ref)

    a = adj_ref[...].astype(compute_dtype)
    start = pl.multiple_of(k * tk, tk)
    f = feat_ref[pl.ds(start, tk), :]
    out_ref[...] += jnp.dot(a, f, preferred_element_type=jnp.float32)

    @pl.when(k == pl.num_programs(1) - 1)
    def _():
        out_ref[...] = d_ref[...] * out_ref[...]


def _plan_pass2(n_pad, h_pad, budget, feat_itemsize, resident_override):
    tk = _pick_tile(n_pad, (1024, 512, 256, 128))
    tm = _pick_tile(n_pad, (2048, 1024, 512, 256, 128), prefer_two_blocks=True)

    def fixed_bytes(tm_, tk_):
        adj = 2 * tm_ * tk_ * 4                 # f32 adjacency tile, double-buffered
        cast = tm_ * tk_ * feat_itemsize        # in-kernel bf16 copy of the tile
        out = 2 * tm_ * h_pad * 4               # resident f32 accumulator block
        dot = tm_ * h_pad * 4                   # dot-product temporary
        dvec = 2 * tm_ * 128 * 4                # (tm,1) d block (lane-padded estimate)
        return adj + cast + out + dot + dvec

    def stream_bytes(tk_):
        return 2 * tk_ * h_pad * feat_itemsize

    while fixed_bytes(tm, tk) + stream_bytes(tk) > budget:
        if tm > 128:
            tm //= 2
        elif tk > 128:
            tk //= 2
        else:
            break  # TODO(synk): block the hidden dim as an extra grid axis for huge h
    # Constant-index blocks are still double-buffered by the pipeline, so the
    # resident slab is accounted at 2x against the generation-aware budget.
    resident_slab = 2 * n_pad * h_pad * feat_itemsize
    if resident_override is None:
        resident = fixed_bytes(tm, tk) + resident_slab <= budget
    else:
        resident = bool(resident_override)
    return tm, tk, resident


# ---------------------------------------------------------------------------
# Wrapper
# ---------------------------------------------------------------------------
def gcn_layer(features, adj_mat, *, compute_dtype=jnp.bfloat16, resident_features=None):
    """Pallas equivalent of GCN_layer.forward(features, adj_mat).

    The f32 adjacency is streamed from HBM unchanged in both passes; the rowsum
    (hence d) is computed in full f32, and only the MXU operands are cast to
    `compute_dtype` (bf16 default: exact for 0/1 + self-loop adjacencies,
    ~1e-3 relative for weighted graphs; pass jnp.float32 for full parity).
    """
    n, h = features.shape
    assert adj_mat.shape == (n, n), "adj_mat must be [n_nodes, n_nodes]"

    features = features.astype(jnp.float32)
    adj_mat = adj_mat.astype(jnp.float32)

    n_pad = _round_up(n, 128)
    h_pad = _round_up(h, 128)
    vmem_limit, budget = _vmem_policy()

    # Pad only to the 128 layout granule (waste <= a few %).  Zero rows/cols are
    # inert: rowsum 0 -> d 0 -> no contribution.  Skipped entirely for aligned n.
    # TODO(synk): fold this pad into pass 1 via edge-block masking so ragged n
    # costs no extra N^2 HBM pass either.
    if n_pad != n:
        adj_mat = jnp.pad(adj_mat, ((0, n_pad - n), (0, n_pad - n)))

    # ---- pass 1: d = rowsum(adj)^-1/2 (f32 throughout) ----------------------
    tm1, tc1 = _plan_pass1(n_pad, budget)
    d = _compute_d_inv_sqrt(adj_mat, tm=tm1, tc=tc1, vmem_limit=vmem_limit)

    # ---- column-side scale + cast, O(N*H) (tiny next to the N^2 passes) -----
    if n_pad != n or h_pad != h:
        features = jnp.pad(features, ((0, n_pad - n), (0, h_pad - h)))
    feat_scaled = (features * d).astype(compute_dtype)

    # ---- pass 2: out = diag(d) @ adj @ feat_scaled ---------------------------
    tm, tk, resident = _plan_pass2(n_pad, h_pad, budget,
                                   jnp.dtype(compute_dtype).itemsize,
                                   resident_features)
    if resident:
        kernel = functools.partial(_gcn_kernel_resident, tk, compute_dtype)
        feat_spec = pl.BlockSpec((n_pad, h_pad), lambda i, k: (0, 0))
    else:
        kernel = functools.partial(_gcn_kernel_streamed, compute_dtype)
        feat_spec = pl.BlockSpec((tk, h_pad), lambda i, k: (k, 0))

    out = pl.pallas_call(
        kernel,
        out_shape=jax.ShapeDtypeStruct((n_pad, h_pad), jnp.float32),
        grid=(n_pad // tm, n_pad // tk),
        in_specs=[
            pl.BlockSpec((tm, 1), lambda i, k: (i, 0)),      # d (row side)
            pl.BlockSpec((tm, tk), lambda i, k: (i, k)),     # adjacency tile (f32)
            feat_spec,                                       # d-scaled features
        ],
        out_specs=pl.BlockSpec((tm, h_pad), lambda i, k: (i, 0)),
        compiler_params=pltpu.CompilerParams(
            dimension_semantics=("parallel", "arbitrary"),
            vmem_limit_bytes=vmem_limit),
    )(d, adj_mat, feat_scaled)

    if n_pad != n or h_pad != h:
        out = out[:n, :h]
    return out


# ---------------------------------------------------------------------------
# Reference (plain JAX, f32) for verification
# ---------------------------------------------------------------------------
def gcn_layer_ref(features, adj_mat):
    rowsum = adj_mat.sum(axis=1)
    d_inv_sqrt = jnp.where(rowsum > 0.0, rowsum ** -0.5, 0.0)
    adj_norm = d_inv_sqrt[:, None] * adj_mat * d_inv_sqrt[None, :]
    return adj_norm @ features


if __name__ == "__main__":
    key = jax.random.PRNGKey(0)
    k1, k2 = jax.random.split(key)

    # case 1: 128-aligned shapes (no wrapper pads, resident-feature fast path)
    n_nodes, hidden = 256, 128
    a = jax.random.uniform(k1, (n_nodes, n_nodes), dtype=jnp.float32)
    adj = ((a + a.T) > 1.2).astype(jnp.float32) + jnp.eye(n_nodes, dtype=jnp.float32)
    features = jax.random.normal(k2, (n_nodes, hidden), dtype=jnp.float32)

    out = jax.block_until_ready(gcn_layer(features, adj))
    ref = gcn_layer_ref(features, adj)
    assert jnp.allclose(out, ref, atol=1e-2, rtol=1e-2), "mismatch vs reference (case 1)"

    # case 2: ragged shapes (128-pad path) + streamed-feature kernel
    n2, h2 = 200, 96
    a2 = jax.random.uniform(k1, (n2, n2), dtype=jnp.float32)
    adj2 = ((a2 + a2.T) > 1.2).astype(jnp.float32) + jnp.eye(n2, dtype=jnp.float32)
    feat2 = jax.random.normal(k2, (n2, h2), dtype=jnp.float32)

    out2 = jax.block_until_ready(gcn_layer(feat2, adj2, resident_features=False))
    ref2 = gcn_layer_ref(feat2, adj2)
    assert jnp.allclose(out2, ref2, atol=1e-2, rtol=1e-2), "mismatch vs reference (case 2)"

    print("KERNEL_OK")
</pallas_src>

<mosaic_0001>
module attributes {stable_mosaic.version = 11 : i64} {
  func.func @_dinv_kernel(%arg0: i32, %arg1: i32, %arg2: memref<128x256xf32, #tpu.memory_space<vmem>>, %arg3: memref<128x1xf32, #tpu.memory_space<vmem>>, %arg4: memref<128x128xf32, #tpu.memory_space<vmem>>) attributes {dimension_semantics = [#tpu.dimension_semantics<parallel>, #tpu.dimension_semantics<arbitrary>], iteration_bounds = array<i64: 2, 1>, scalar_prefetch = 0 : i64, scratch_operands = 1 : i64, tpu.core_type = #tpu.core_type<tc>, window_params = [{transform_indices = @transform_0, window_bounds = array<i64: 128, 256>}, {transform_indices = @transform_1, window_bounds = array<i64: 128, 1>}]} {
    %c0_i32 = arith.constant 0 : i32
    %0 = arith.cmpi eq, %arg1, %c0_i32 : i32
    %1 = arith.extui %0 : i1 to i32
    %c0_i32_0 = arith.constant 0 : i32
    %2 = arith.cmpi ne, %1, %c0_i32_0 : i32
    scf.if %2 {
      %cst = arith.constant 0.000000e+00 : f32
      %13 = vector.broadcast %cst : f32 to vector<128x128xf32>
      %c0_8 = arith.constant 0 : index
      %c0_9 = arith.constant 0 : index
      %14 = vector.load %arg4[%c0_8, %c0_9] : memref<128x128xf32, #tpu.memory_space<vmem>>, vector<128x128xf32>
      tpu.vector_store %arg4[%c0_8, %c0_9], %13 {strides = array<i32>} : memref<128x128xf32, #tpu.memory_space<vmem>>, vector<128x128xf32>,
    } else {
    }
    %c0 = arith.constant 0 : index
    %c0_1 = arith.constant 0 : index
    %3 = vector.load %arg2[%c0, %c0_1] : memref<128x256xf32, #tpu.memory_space<vmem>>, vector<128x256xf32>
    %4 = vector.extract_strided_slice %3 {offsets = [0, 0], sizes = [128, 128], strides = [1, 1]} : vector<128x256xf32> to vector<128x128xf32>
    %5 = vector.extract_strided_slice %3 {offsets = [0, 128], sizes = [128, 128], strides = [1, 1]} : vector<128x256xf32> to vector<128x128xf32>
    %6 = arith.addf %4, %5 : vector<128x128xf32>
    %c0_2 = arith.constant 0 : index
    %c0_3 = arith.constant 0 : index
    %7 = vector.load %arg4[%c0_2, %c0_3] : memref<128x128xf32, #tpu.memory_space<vmem>>, vector<128x128xf32>
    %8 = arith.addf %7, %6 : vector<128x128xf32>
    %c0_4 = arith.constant 0 : index
    %c0_5 = arith.constant 0 : index
    %9 = vector.load %arg4[%c0_4, %c0_5] : memref<128x128xf32, #tpu.memory_space<vmem>>, vector<128x128xf32>
    tpu.vector_store %arg4[%c0_4, %c0_5], %8 {strides = array<i32>} : memref<128x128xf32, #tpu.memory_space<vmem>>, vector<128x128xf32>,
    %c0_i32_6 = arith.constant 0 : i32
    %10 = arith.cmpi eq, %arg1, %c0_i32_6 : i32
    %11 = arith.extui %10 : i1 to i32
    %c0_i32_7 = arith.constant 0 : i32
    %12 = arith.cmpi ne, %11, %c0_i32_7 : i32
    scf.if %12 {
      %c0_8 = arith.constant 0 : index
      %c0_9 = arith.constant 0 : index
      %13 = vector.load %arg4[%c0_8, %c0_9] : memref<128x128xf32, #tpu.memory_space<vmem>>, vector<128x128xf32>
      %cst = arith.constant dense<0.000000e+00> : vector<128xf32>
      %14 = vector.multi_reduction <add>, %13, %cst [1] : vector<128x128xf32> to vector<128xf32>
      %15 = vector.shape_cast %14 : vector<128xf32> to vector<128x1xf32>
      %cst_10 = arith.constant 0.000000e+00 : f32
      %16 = vector.broadcast %cst_10 : f32 to vector<128x1xf32>
      %17 = arith.cmpf ogt, %15, %16 : vector<128x1xf32>
      %18 = math.rsqrt %15 : vector<128x1xf32>
      %cst_11 = arith.constant 0.000000e+00 : f32
      %19 = vector.broadcast %cst_11 : f32 to vector<128x1xf32>
      %20 = arith.select %17, %18, %19 : vector<128x1xi1>, vector<128x1xf32>
      %c0_12 = arith.constant 0 : index
      %c0_13 = arith.constant 0 : index
      %21 = vector.load %arg3[%c0_12, %c0_13] : memref<128x1xf32, #tpu.memory_space<vmem>>, vector<128x1xf32>
      tpu.vector_store %arg3[%c0_12, %c0_13], %20 {strides = array<i32>} : memref<128x1xf32, #tpu.memory_space<vmem>>, vector<128x1xf32>,
    } else {
    }
    return
  }
  func.func @transform_0(%arg0: i32, %arg1: i32) -> (i32, i32) {
    %c0_i32 = arith.constant 0 : i32
    return %arg0, %arg1 : i32, i32
  }
  func.func @transform_1(%arg0: i32, %arg1: i32) -> (i32, i32) {
    %c0_i32 = arith.constant 0 : i32
    %c0_i32_0 = arith.constant 0 : i32
    return %arg0, %c0_i32 : i32, i32
  }
}

</mosaic_0001>

<bundles_post_ra>
// kernel: tpu_custom_call.1
= control target key start
LH: loop header
LB: loop body
LE: loop exit
PB: predicated region body
PF: predicated region fallthrough
CT: control target
= control target key end

     0   :  { %6 = vsyncpa [#allocation4], 0  ;;  %s859_s0 = inlined_call_operand.hbm [shape: f32[256,256], index: 0, kind: input, shape index: {}]   ;;  %s860_s1 = inlined_call_operand.vmem [shape: f32[256,1], index: 1, kind: output, shape index: {}]  }
   0x1   :  { %8 = vsyncpa [#allocation4 + $0x1], 0  ;;  %s668_s6 = smov 0   ;;  %s670_s7 = smov 0  }
   0x2   :  { %s672_s8 = smov 0   ;;  %s674_s9 = smov 0  }
   0x3   :  { %s676_s10 = smov 0   ;;  %s678_s11 = smov 0  }
   0x4 LB: > { %s468_s12 = sadd.s32 4294967295, %s653_s11   ;;  %s26_s13 = sadd.s32 1, %s649_s10  ;;  %s653_s11 = sphi %s678_s11, %s14_s11   ;;  %s649_s10 = sphi %s676_s10, %s868_s10   ;;  %s645_s9 = sphi %s674_s9, %s867_s9   ;;  %s641_s8 = sphi %s672_s8, %s866_s8   ;;  %s637_s7 = sphi %s670_s7, %s865_s7   ;;  %s633_s6 = sphi %s668_s6, %s864_s6  }
   0x5   : > { %p28_p0 = scmp.ge.s32.totalorder %s26_s13, 2  ;;  %s35_s14 = sadd.s32 1, %s641_s8 }
   0x6   : > { %p42_p1 = scmp.ne.s32.totalorder %s641_s8, %s637_s7  ;;  %p43_p2 = scmp.eq.s32.totalorder %s653_s11, 0 }
   0x7   : > { %s870_s13 = smov (%p28_p0, %s26_s13), 0  ;;  %p48_p4 = scmp.ne.s32.totalorder %s637_s7, %s633_s6 }
   0x8   : > { %p704_p3 = por %p43_p2, %p42_p1  ;;  %s30_s16 = ssub.s32 %s649_s10, %s870_s13 }
   0x9   : > { %p49_p5 = scmp.eq.s32.totalorder %s468_s12, 0  ;;  %p33_p6 = scmp.eq.s32.totalorder %s30_s16, 0 }
   0xa   : > { %p490_p8 = scmp.lt.s32.totalorder %s653_s11, 2  ;;  %s98_s19 = sand.u32 1, %s641_s8  }
   0xb   : > { %p711_p7 = por %p49_p5, %p48_p4  ;;  %s483_s20 = sshll.u32 %s649_s10, 12 }
   0xc   : > { %s717_s18 = scalar_select %p33_p6, %s641_s8, %s35_s14  }
   0xd   : > { %s472_s21 = sshll.u32 %s98_s19, 8  ;;  %s724_s24 = scalar_lea.hbm %s859_s0, %s483_s20 }
   0xe   : > { %s102_s25 = scalar_lea.vmem [#allocation3], %s472_s21  ;;  %p728_p9 = pnand %p490_p8, %p704_p3 }
   0xf   : > { %s112_s26 = sshll.u32 %s102_s25, 4  ;;  %s734_s28 = scalar_lea.sflag [#allocation4], %s98_s19  ;;  %s732_s26 = int_to_ptr.vmem [resolvable:$true] %s112_s26 }
  0x10   : > { %s573_s29 = scalar_lea.hbm %s724_s24, 4096  ;;  %p575_p11 = pneg %p728_p9 }
  0x11   : > { %p574_p10 = scmp.ne.s32.totalorder %s724_s24, %s573_s29  ;;  %s578_s3 = scalar_lea.hbm %s859_s0, 8192 }
  0x12   : > { %p579_p0 = scmp.lt.u32.totalorder %s724_s24, %s859_s0  ;;  %p580_p1 = scmp.lt.u32.totalorder %s578_s3, %s573_s29 }
  0x13   : > { %p576_p12 = pnand %p575_p11, %p574_p10  ;;  %p582_p3 = scmp.lt.u32.totalorder %s573_s29, %s724_s24 }
  0x14   : > { %p581_p2 = por %p580_p1, %p579_p0 }
  0x15   : > { %p577_p13 = pneg %p576_p12 }
  0x16   : > { %p583_p4 = por %p582_p3, %p581_p2 }
  0x18   : > { %p584_p5 = pnand %p583_p4, %p577_p13 }
  0x1a   : > { %587 = shalt.err (!%p584_p5)
}
  0x1b   : > { %s588_s6 = scalar_lea.vmem %s732_s26, 4096  ;;  %s655_s12 = smov [#allocation3]  }
  0x1c   : > { %p589_p6 = scmp.ne.s32.totalorder %s732_s26, %s588_s6  ;;  %s593_s14 = sshll.u32 %s655_s12, 4  ;;  %s594_s14 = int_to_ptr.vmem [resolvable:$false] %s593_s14 }
  0x1d   : > { %s595_s15 = scalar_lea.vmem %s594_s14, 8192  ;;  %p596_p12 = scmp.lt.s32.totalorder %s732_s26, %s594_s14 }
  0x1e   : > { %p591_p8 = pnand %p589_p6, %p575_p11  ;;  %p597_p0 = scmp.lt.s32.totalorder %s595_s15, %s588_s6 }
  0x20   : > { %p592_p10 = pneg %p591_p8  ;;  %p598_p1 = por %p597_p0, %p596_p12 }
  0x22   : > { %p599_p2 = pnand %p598_p1, %p592_p10 }
  0x24   : > { %602 = shalt.err (!%p599_p2)
}
  0x25   : > { %s656_s16 = smov 256   ;;  %s657_s19 = smov 16  }
  0x26   : > { %489 = dma.hbm_to_vmem [thread:$0]  (!%p728_p9), %s724_s24, 4096, %s732_s26, %s734_s28, %s656_s16, %s656_s16, %s657_s19  }
  0x27   : > { %p476_p11 = scmp.ge.s32.totalorder %s653_s11, 1  ;;  %p120_p13 = scmp.lt.s32.totalorder %s653_s11, 3 }
  0x29   : > { %p121_p3 = pnand %p476_p11, %p120_p13 }
  0x2a   : > { %s126_s20 = sand.u32 (!%p121_p3), 1, %s637_s7  }
  0x2b   : > { %124 = sbr.rel (%p121_p3) target bundleno = 238 (0xee), region = 24  ;;  %s477_s21 = sshll.u32 (!%p121_p3), %s126_s20, 8 }
  0x2c   : > { %s127_s22 = scalar_lea.sflag (!%p121_p3), [#allocation4], %s126_s20  ;;  %s765_s23 = scalar_lea.vmem (!%p121_p3), [#allocation3], %s477_s21 }
  0x32   : > { %628 = dma.done.wait (%p711_p7), %s127_s22, 4096  }
  0x33   : > { %630 = vsyncadd (%p711_p7), %s127_s22, 4294963200  ;;  %v181_v0 = vld [vmem:[%s765_s23 + $0x20] sm:$0xff]  ;;  %v182_v1 = vld [vmem:[%s765_s23 + $0x28] sm:$0xff]  ;;  %s478_s17 = sshll.u32 %s645_s9, 4  ;;  %vm372_vm0 = vcmask 7168  }
  0x34   : > { %v177_v2 = vld [vmem:[%s765_s23] sm:$0xff]  ;;  %v211_v3 = vadd.f32 %v182_v1, %v181_v0  ;;  %v178_v4 = vld [vmem:[%s765_s23 + $0x8] sm:$0xff]  ;;  %v183_v5 = vld [vmem:[%s765_s23 + $0x30] sm:$0xff]  ;;  %p152_p7 = scmp.lt.s32.totalorder %s478_s17, 31 }
  0x35   : > { %v184_v6 = vld [vmem:[%s765_s23 + $0x38] sm:$0xff]  ;;  %v209_v7 = vadd.f32 %v178_v4, %v177_v2  ;;  %v179_v8 = vld [vmem:[%s765_s23 + $0x10] sm:$0xff]  ;;  %v185_v14 = vld [vmem:[%s765_s23 + $0x40] sm:$0xff] }
  0x36   : > { %v180_v9 = vld [vmem:[%s765_s23 + $0x18] sm:$0xff]  ;;  %296 = vadd.xlane.f32.xlu1 %v211_v3  ;;  %v212_v10 = vadd.f32 %v184_v6, %v183_v5  ;;  %v187_v12 = vld [vmem:[%s765_s23 + $0x50] sm:$0xff]  ;;  %v186_v15 = vld [vmem:[%s765_s23 + $0x48] sm:$0xff]  ;;  %s872_s17 = smov (!%p152_p7, %s478_s17), 31 }
  0x37   : > { %292 = vadd.xlane.f32.xlu0 %v209_v7  ;;  %v210_v11 = vadd.f32 %v180_v9, %v179_v8  ;;  %v188_v13 = vld [vmem:[%s765_s23 + $0x58] sm:$0xff]  ;;  %v213_v17 = vadd.f32 %v186_v15, %v185_v14  ;;  %v191_v18 = vld [vmem:[%s765_s23 + $0x70] sm:$0xff]  ;;  %v189_v20 = vld [vmem:[%s765_s23 + $0x60] sm:$0xff]  ;;  %s479_s24 = sshll.u32 %s872_s17, 3 }
  0x38   : > { %v214_v16 = vadd.f32 %v188_v13, %v187_v12  ;;  %v192_v19 = vld [vmem:[%s765_s23 + $0x78] sm:$0xff]  ;;  %v190_v21 = vld [vmem:[%s765_s23 + $0x68] sm:$0xff]  ;;  %v195_v24 = vld [vmem:[%s765_s23 + $0x90] sm:$0xff]  ;;  %s807_s27 = scalar_lea.vmem %s860_s1, %s479_s24 }
  0x39   : > { %v216_v22 = vadd.f32 %v192_v19, %v191_v18  ;;  %v215_v23 = vadd.f32 %v190_v21, %v189_v20  ;;  %v196_v25 = vld [vmem:[%s765_s23 + $0x98] sm:$0xff]  ;;  %v193_v26 = vld [vmem:[%s765_s23 + $0x80] sm:$0xff]  ;;  %v194_v27 = vld [vmem:[%s765_s23 + $0x88] sm:$0xff] }
  0x3a   : > { %298 = vadd.xlane.f32.xlu1 %v212_v10  ;;  %v218_v28 = vadd.f32 %v196_v25, %v195_v24  ;;  %v217_v29 = vadd.f32 %v194_v27, %v193_v26  ;;  %v199_v30 = vld [vmem:[%s765_s23 + $0xb0] sm:$0xff]  ;;  %v200_v31 = vld [vmem:[%s765_s23 + $0xb8] sm:$0xff]  ;;  %v197_v32 = vld [vmem:[%s765_s23 + $0xa0] sm:$0xff] }
  0x3b   : > { %294 = vadd.xlane.f32.xlu0 %v210_v11  ;;  %v198_v33 = vld [vmem:[%s765_s23 + $0xa8] sm:$0xff]  ;;  %v220_v34 = vadd.f32 %v200_v31, %v199_v30  ;;  %v203_v36 = vld [vmem:[%s765_s23 + $0xd0] sm:$0xff]  ;;  %v204_v37 = vld [vmem:[%s765_s23 + $0xd8] sm:$0xff] }
  0x3c   : > { %v219_v35 = vadd.f32 %v198_v33, %v197_v32  ;;  %v201_v38 = vld [vmem:[%s765_s23 + $0xc0] sm:$0xff]  ;;  %v202_v39 = vld [vmem:[%s765_s23 + $0xc8] sm:$0xff]  ;;  %v222_v40 = vadd.f32 %v204_v37, %v203_v36  ;;  %v207_v42 = vld [vmem:[%s765_s23 + $0xf0] sm:$0xff] }
  0x3d   : > { %v221_v41 = vadd.f32 %v202_v39, %v201_v38  ;;  %v208_v43 = vld [vmem:[%s765_s23 + $0xf8] sm:$0xff]  ;;  %v205_v44 = vld [vmem:[%s765_s23 + $0xe0] sm:$0xff]  ;;  %v206_v45 = vld [vmem:[%s765_s23 + $0xe8] sm:$0xff] }
  0x3e   : > { %302 = vadd.xlane.f32.xlu1 %v214_v16  ;;  %v224_v46 = vadd.f32 %v208_v43, %v207_v42  ;;  %v223_v47 = vadd.f32 %v206_v45, %v205_v44 }
  0x3f   : > { %300 = vadd.xlane.f32.xlu0 %v213_v17 }
  0x42   : > { %306 = vadd.xlane.f32.xlu1 %v216_v22 }
  0x43   : > { %304 = vadd.xlane.f32.xlu0 %v215_v23 }
  0x46   : > { %310 = vadd.xlane.f32.xlu1 %v218_v28 }
  0x47   : > { %308 = vadd.xlane.f32.xlu0 %v217_v29 }
  0x4a   : > { %314 = vadd.xlane.f32.xlu1 %v220_v34 }
  0x4b   : > { %312 = vadd.xlane.f32.xlu0 %v219_v35 }
  0x4e   : > { %318 = vadd.xlane.f32.xlu1 %v222_v40 }
  0x4f   : > { %316 = vadd.xlane.f32.xlu0 %v221_v41 }
  0x52   : > { %322 = vadd.xlane.f32.xlu1 %v224_v46 }
  0x53   : > { %320 = vadd.xlane.f32.xlu0 %v223_v47 }
  0xc3   : > { %v297_v48 = vpop.xlane.xlu1 %296 }
  0xc4   : > { %541 = vrsqrt.f32 %v297_v48  ;;  %v293_v49 = vpop.xlane.xlu0 %292  ;;  %vm326_vm1 = vcmp.gt.f32.partialorder %v297_v48, 0.0 }
  0xc5   : > { %543 = vrsqrt.f32 %v293_v49  ;;  %vm324_vm2 = vcmp.gt.f32.partialorder %v293_v49, 0.0 }
  0xc7   : > { %v299_v50 = vpop.xlane.xlu1 %298 }
  0xc8   : > { %545 = vrsqrt.f32 %v299_v50  ;;  %v295_v51 = vpop.xlane.xlu0 %294  ;;  %vm327_vm3 = vcmp.gt.f32.partialorder %v299_v50, 0.0 }
  0xc9   : > { %547 = vrsqrt.f32 %v295_v51  ;;  %vm325_vm4 = vcmp.gt.f32.partialorder %v295_v51, 0.0 }
  0xcb   : > { %v303_v52 = vpop.xlane.xlu1 %302 }
  0xcc   : > { %549 = vrsqrt.f32 %v303_v52  ;;  %v301_v53 = vpop.xlane.xlu0 %300  ;;  %vm329_vm5 = vcmp.gt.f32.partialorder %v303_v52, 0.0 }
  0xcd   : > { %551 = vrsqrt.f32 %v301_v53  ;;  %vm328_vm6 = vcmp.gt.f32.partialorder %v301_v53, 0.0 }
  0xce   : > { %v542_v54 = vpop.eup %541 }
  0xcf   : > { %v544_v55 = vpop.eup %543  ;;  %v358_v56 = vsel %vm326_vm1, %v542_v54, 0.0  ;;  %v307_v57 = vpop.xlane.xlu1 %306 }
  0xd0   : > { %375 = vst.msk [vmem:[%s807_s27 + $0x10] sm:$0xff] %vm372_vm0, %v358_v56  ;;  %v356_v58 = vsel %vm324_vm2, %v544_v55, 0.0  ;;  %553 = vrsqrt.f32 %v307_v57  ;;  %v305_v59 = vpop.xlane.xlu0 %304  ;;  %vm331_vm7 = vcmp.gt.f32.partialorder %v307_v57, 0.0 }
  0xd1   : > { %373 = vst.msk [vmem:[%s807_s27] sm:$0xff] %vm372_vm0, %v356_v58  ;;  %555 = vrsqrt.f32 %v305_v59  ;;  %vm330_vm8 = vcmp.gt.f32.partialorder %v305_v59, 0.0 }
  0xd2   : > { %v546_v60 = vpop.eup %545 }
  0xd3   : > { %v548_v61 = vpop.eup %547  ;;  %v359_v62 = vsel %vm327_vm3, %v546_v60, 0.0  ;;  %v311_v63 = vpop.xlane.xlu1 %310 }
  0xd4   : > { %376 = vst.msk [vmem:[%s807_s27 + $0x18] sm:$0xff] %vm372_vm0, %v359_v62  ;;  %v357_v0 = vsel %vm325_vm4, %v548_v61, 0.0  ;;  %557 = vrsqrt.f32 %v311_v63  ;;  %v309_v1 = vpop.xlane.xlu0 %308  ;;  %vm333_vm9 = vcmp.gt.f32.partialorder %v311_v63, 0.0 }
  0xd5   : > { %374 = vst.msk [vmem:[%s807_s27 + $0x8] sm:$0xff] %vm372_vm0, %v357_v0  ;;  %559 = vrsqrt.f32 %v309_v1  ;;  %vm332_vm10 = vcmp.gt.f32.partialorder %v309_v1, 0.0 }
  0xd6   : > { %v550_v2 = vpop.eup %549 }
  0xd7   : > { %v552_v3 = vpop.eup %551  ;;  %v361_v4 = vsel %vm329_vm5, %v550_v2, 0.0  ;;  %v315_v5 = vpop.xlane.xlu1 %314 }
  0xd8   : > { %378 = vst.msk [vmem:[%s807_s27 + $0x28] sm:$0xff] %vm372_vm0, %v361_v4  ;;  %v360_v6 = vsel %vm328_vm6, %v552_v3, 0.0  ;;  %561 = vrsqrt.f32 %v315_v5  ;;  %v313_v7 = vpop.xlane.xlu0 %312  ;;  %vm335_vm11 = vcmp.gt.f32.partialorder %v315_v5, 0.0 }
  0xd9   : > { %377 = vst.msk [vmem:[%s807_s27 + $0x20] sm:$0xff] %vm372_vm0, %v360_v6  ;;  %563 = vrsqrt.f32 %v313_v7  ;;  %vm334_vm12 = vcmp.gt.f32.partialorder %v313_v7, 0.0 }
  0xda   : > { %v554_v8 = vpop.eup %553 }
  0xdb   : > { %v556_v9 = vpop.eup %555  ;;  %v363_v10 = vsel %vm331_vm7, %v554_v8, 0.0  ;;  %v319_v11 = vpop.xlane.xlu1 %318 }
  0xdc   : > { %380 = vst.msk [vmem:[%s807_s27 + $0x38] sm:$0xff] %vm372_vm0, %v363_v10  ;;  %v362_v12 = vsel %vm330_vm8, %v556_v9, 0.0  ;;  %565 = vrsqrt.f32 %v319_v11  ;;  %v317_v13 = vpop.xlane.xlu0 %316  ;;  %vm337_vm13 = vcmp.gt.f32.partialorder %v319_v11, 0.0 }
  0xdd   : > { %379 = vst.msk [vmem:[%s807_s27 + $0x30] sm:$0xff] %vm372_vm0, %v362_v12  ;;  %567 = vrsqrt.f32 %v317_v13  ;;  %vm336_vm14 = vcmp.gt.f32.partialorder %v317_v13, 0.0 }
  0xde   : > { %v558_v14 = vpop.eup %557 }
  0xdf   : > { %v560_v15 = vpop.eup %559  ;;  %v365_v16 = vsel %vm333_vm9, %v558_v14, 0.0  ;;  %v323_v17 = vpop.xlane.xlu1 %322 }
  0xe0   : > { %382 = vst.msk [vmem:[%s807_s27 + $0x48] sm:$0xff] %vm372_vm0, %v365_v16  ;;  %v364_v18 = vsel %vm332_vm10, %v560_v15, 0.0  ;;  %569 = vrsqrt.f32 %v323_v17  ;;  %v321_v19 = vpop.xlane.xlu0 %320  ;;  %vm339_vm15 = vcmp.gt.f32.partialorder %v323_v17, 0.0 }
  0xe1   : > { %381 = vst.msk [vmem:[%s807_s27 + $0x40] sm:$0xff] %vm372_vm0, %v364_v18  ;;  %571 = vrsqrt.f32 %v321_v19  ;;  %vm338_vm1 = vcmp.gt.f32.partialorder %v321_v19, 0.0 }
  0xe2   : > { %v562_v20 = vpop.eup %561 }
  0xe3   : > { %v564_v21 = vpop.eup %563  ;;  %v367_v22 = vsel %vm335_vm11, %v562_v20, 0.0 }
  0xe4   : > { %384 = vst.msk [vmem:[%s807_s27 + $0x58] sm:$0xff] %vm372_vm0, %v367_v22  ;;  %v366_v23 = vsel %vm334_vm12, %v564_v21, 0.0 }
  0xe5   : > { %383 = vst.msk [vmem:[%s807_s27 + $0x50] sm:$0xff] %vm372_vm0, %v366_v23 }
  0xe6   : > { %v566_v24 = vpop.eup %565 }
  0xe7   : > { %v568_v25 = vpop.eup %567  ;;  %v369_v26 = vsel %vm337_vm13, %v566_v24, 0.0 }
  0xe8   : > { %386 = vst.msk [vmem:[%s807_s27 + $0x68] sm:$0xff] %vm372_vm0, %v369_v26  ;;  %v368_v27 = vsel %vm336_vm14, %v568_v25, 0.0 }
  0xe9   : > { %385 = vst.msk [vmem:[%s807_s27 + $0x60] sm:$0xff] %vm372_vm0, %v368_v27 }
  0xea   : > { %v570_v28 = vpop.eup %569 }
  0xeb   : > { %v572_v29 = vpop.eup %571  ;;  %v371_v30 = vsel %vm339_vm15, %v570_v28, 0.0 }
  0xec   : > { %388 = vst.msk [vmem:[%s807_s27 + $0x78] sm:$0xff] %vm372_vm0, %v371_v30  ;;  %v370_v31 = vsel %vm338_vm1, %v572_v29, 0.0 }
  0xed   : > { %387 = vst.msk [vmem:[%s807_s27 + $0x70] sm:$0xff] %vm372_vm0, %v370_v31 }
  0xee PF: > { %s14_s11 = sadd.s32 1, %s653_s11   ;;  %s864_s6 = smov %s637_s7 }
  0xef   : > { %p11_p9 = scmp.ge.s32.totalorder %s14_s11, 4   ;;  %s865_s7 = smov %s641_s8 }
  0xf0   : > { %s866_s8 = smov %s717_s18  ;;  %s867_s9 = smov %s649_s10 }
  0xf1   : > { %s868_s10 = smov %s870_s13  ;;  %13 = sbr.rel (!%p11_p9) target bundleno = 4 (0x4), region = 72 }
  0xf8   :  { %411 = vsyncpa [#allocation4], 1 }
  0xf9   :  { %413 = vsyncpa [#allocation4 + $0x1], 1 }

</bundles_post_ra>
